<compile_context>
chip_gen: v5e
topology: v5e:2x2
jax: 0.10.0
libtpu: 0.0.40
codegen_flags: <defaults>
</compile_context>

<pallas_src>
import functools
import math

import jax
import jax.numpy as jnp
from jax import lax
from jax.experimental import pallas as pl
from jax.experimental.pallas import tpu as pltpu


def mha_kernel(x_ref, wqkv_ref, wo_ref, o_ref, *, num_heads, causal):
    Bb, T, E = x_ref.shape
    d = E // num_heads
    scale = 1.0 / math.sqrt(d)

    # ---- fused QKV projection: one (Bb*T, E) @ (E, 3E) matmul (bf16 -> f32) ----
    x2 = x_ref[...].reshape(Bb * T, E)                       # bf16
    qkv = jnp.dot(x2, wqkv_ref[...], preferred_element_type=jnp.float32)

    q = (qkv[:, :E] * scale).astype(jnp.bfloat16).reshape(Bb, T, E)
    k = qkv[:, E:2 * E].astype(jnp.bfloat16).reshape(Bb, T, E)
    v = qkv[:, 2 * E:].astype(jnp.bfloat16).reshape(Bb, T, E)

    # Additive causal bias, computed once and shared by every head.
    if causal:
        rows = lax.broadcasted_iota(jnp.int32, (T, T), 0)
        cols = lax.broadcasted_iota(jnp.int32, (T, T), 1)
        bias = jnp.where(cols <= rows, jnp.float32(0.0), jnp.float32(-1e30))[None]

    # fp32 accumulator for the (head-folded) output projection.
    y = jnp.zeros((Bb * T, E), jnp.float32)

    for h in range(num_heads):            # small static unroll; batched over Bb
        qh = q[:, :, h * d:(h + 1) * d]   # (Bb, T, d) bf16
        kh = k[:, :, h * d:(h + 1) * d]
        vh = v[:, :, h * d:(h + 1) * d]

        s = jnp.einsum('bqd,bkd->bqk', qh, kh,
                       preferred_element_type=jnp.float32)   # (Bb, T, T) f32
        if causal:
            s = s + bias

        # numerically-stable softmax in fp32 (keeps v5e's fp32-only VPU happy)
        m = jnp.max(s, axis=-1, keepdims=True)
        p = jnp.exp(s - m)
        l = jnp.sum(p, axis=-1, keepdims=True)
        inv_l = pl.reciprocal(l, approx=True)    # EUP slot, not a VPU divide

        oh = jnp.einsum('bqk,bkd->bqd', p.astype(jnp.bfloat16), vh,
                        preferred_element_type=jnp.float32)
        oh = (oh * inv_l).reshape(Bb * T, d).astype(jnp.bfloat16)

        # Fold the output projection per head -> no lane-axis concatenate.
        y = y + jnp.dot(oh, wo_ref[h * d:(h + 1) * d, :],
                        preferred_element_type=jnp.float32)

    o_ref[...] = y.reshape(Bb, T, E).astype(o_ref.dtype)


def multihead_attention(x, in_proj_weight, out_proj_weight, *, num_heads,
                        causal=True):
    """x: (B, T, E) float32. in_proj_weight: (3E, E). out_proj_weight: (E, E)."""
    B, T, E = x.shape
    assert E % num_heads == 0

    # F.linear(x, W) == x @ W.T.  in_proj_weight is [Wq; Wk; Wv] stacked along
    # rows, so a single transpose gives the fused (E, 3E) QKV weight.
    wqkv = in_proj_weight.T.astype(jnp.bfloat16)        # (E, 3E)
    wo = out_proj_weight.T.astype(jnp.bfloat16)         # (E, E)
    xb = x.astype(jnp.bfloat16)

    # Fold the batch into at most two grid steps: big per-step blocks amortize
    # the per-step pipeline overhead, while 2 "parallel" steps let both v7x
    # TensorCores participate (v5e/v6e have a single TC).
    grid_b = 2 if (B >= 2 and B % 2 == 0) else 1
    block_b = B // grid_b

    kernel = functools.partial(mha_kernel, num_heads=num_heads, causal=causal)
    return pl.pallas_call(
        kernel,
        out_shape=jax.ShapeDtypeStruct((B, T, E), x.dtype),
        grid=(grid_b,),
        in_specs=[
            pl.BlockSpec((block_b, T, E), lambda b: (b, 0, 0)),
            # Constant index_map -> weights are DMA'd once and stay resident.
            pl.BlockSpec((E, 3 * E), lambda b: (0, 0)),
            pl.BlockSpec((E, E), lambda b: (0, 0)),
        ],
        out_specs=pl.BlockSpec((block_b, T, E), lambda b: (b, 0, 0)),
        compiler_params=pltpu.CompilerParams(
            dimension_semantics=("parallel",),
            # NOTE: at real model sizes set vmem_limit_bytes and re-derive block
            # sizes against 64 MiB (v7x) / 128 MiB (v5e, v6e) physical VMEM.
        ),
    )(xb, wqkv, wo)


def reference_mha(x, in_proj_weight, out_proj_weight, *, num_heads, causal=True):
    """Plain-JAX fp32 reference replicating the PyTorch forward semantics."""
    B, T, E = x.shape
    d = E // num_heads
    q = x @ in_proj_weight[:E].T
    k = x @ in_proj_weight[E:2 * E].T
    v = x @ in_proj_weight[2 * E:].T

    def split(t):
        return t.reshape(B, T, num_heads, d).transpose(0, 2, 1, 3)  # (B, h, T, d)

    q, k, v = split(q), split(k), split(v)
    s = jnp.einsum("bhtd,bhsd->bhts", q, k) / math.sqrt(d)
    if causal:
        mask = jnp.tril(jnp.ones((T, T), dtype=bool))
        s = jnp.where(mask[None, None], s, -1e30)
    p = jax.nn.softmax(s, axis=-1)
    o = jnp.einsum("bhts,bhsd->bhtd", p, v)              # (B, h, T, d)
    o = o.transpose(0, 2, 1, 3).reshape(B, T, E)
    return o @ out_proj_weight.T


if __name__ == "__main__":
    # embed_dim=32, num_heads=4, causal=True, cross_attention=False, rotary_emb=False
    B, T, E, H = 2, 8, 32, 4
    key = jax.random.PRNGKey(0)
    kx, kw_in, kw_out = jax.random.split(key, 3)

    x = jax.random.normal(kx, (B, T, E), dtype=jnp.float32)

    # kaiming_uniform_(a=sqrt(5)) on (3E, E): bound = 1/sqrt(fan_in) = 1/sqrt(E)
    bound = 1.0 / math.sqrt(E)
    in_proj_weight = jax.random.uniform(kw_in, (3 * E, E), dtype=jnp.float32,
                                        minval=-bound, maxval=bound)
    # nn.Linear(E, E, bias=False) default init: same bound
    out_proj_weight = jax.random.uniform(kw_out, (E, E), dtype=jnp.float32,
                                         minval=-bound, maxval=bound)

    # TODO(synk): rotary_emb / key_padding_mask paths not exercised (module is
    # instantiated with rotary_emb=False; causal=True excludes padding masks).

    out = multihead_attention(x, in_proj_weight, out_proj_weight,
                              num_heads=H, causal=True)
    out = jax.block_until_ready(out)

    ref = reference_mha(x, in_proj_weight, out_proj_weight, num_heads=H,
                        causal=True)
    assert out.shape == (B, T, E)
    # bf16 MXU operands + approx reciprocal vs fp32 reference -> loose tolerance.
    assert jnp.allclose(out, ref, atol=3e-2, rtol=3e-2), "mismatch vs reference"

    print("KERNEL_OK")
</pallas_src>

<mosaic_0001>
module attributes {stable_mosaic.version = 11 : i64} {
  func.func @mha_kernel(%arg0: i32, %arg1: memref<1x8x32xbf16, #tpu.memory_space<vmem>>, %arg2: memref<32x96xbf16, #tpu.memory_space<vmem>>, %arg3: memref<32x32xbf16, #tpu.memory_space<vmem>>, %arg4: memref<1x8x32xf32, #tpu.memory_space<vmem>>) attributes {dimension_semantics = [#tpu.dimension_semantics<parallel>], iteration_bounds = array<i64: 2>, scalar_prefetch = 0 : i64, scratch_operands = 0 : i64, tpu.core_type = #tpu.core_type<tc>, window_params = [{transform_indices = @transform_0, window_bounds = array<i64: 1, 8, 32>}, {pipeline_mode = #tpu.pipeline_mode<synchronous>, transform_indices = @transform_1, window_bounds = array<i64: 32, 96>}, {pipeline_mode = #tpu.pipeline_mode<synchronous>, transform_indices = @transform_2, window_bounds = array<i64: 32, 32>}, {transform_indices = @transform_3, window_bounds = array<i64: 1, 8, 32>}]} {
    %c0 = arith.constant 0 : index
    %c0_0 = arith.constant 0 : index
    %c0_1 = arith.constant 0 : index
    %0 = vector.load %arg1[%c0, %c0_0, %c0_1] : memref<1x8x32xbf16, #tpu.memory_space<vmem>>, vector<1x8x32xbf16>
    %1 = vector.shape_cast %0 : vector<1x8x32xbf16> to vector<8x32xbf16>
    %c0_2 = arith.constant 0 : index
    %c0_3 = arith.constant 0 : index
    %2 = vector.load %arg2[%c0_2, %c0_3] : memref<32x96xbf16, #tpu.memory_space<vmem>>, vector<32x96xbf16>
    %cst = arith.constant dense<0.000000e+00> : vector<8x96xf32>
    %3 = tpu.matmul %1, %2, %cst {dimension_numbers = #tpu.dot_dimension_numbers<[1], [0], [0], [1], [0, 0, 1, 1], [], []>} : vector<8x32xbf16>, vector<32x96xbf16>, vector<8x96xf32> -> vector<8x96xf32>
    %4 = vector.extract_strided_slice %3 {offsets = [0, 0], sizes = [8, 32], strides = [1, 1]} : vector<8x96xf32> to vector<8x32xf32>
    %cst_4 = arith.constant 0.353553385 : f32
    %5 = vector.broadcast %cst_4 : f32 to vector<8x32xf32>
    %6 = arith.mulf %4, %5 : vector<8x32xf32>
    %7 = arith.truncf %6 : vector<8x32xf32> to vector<8x32xbf16>
    %8 = vector.shape_cast %7 : vector<8x32xbf16> to vector<1x8x32xbf16>
    %9 = vector.extract_strided_slice %3 {offsets = [0, 32], sizes = [8, 32], strides = [1, 1]} : vector<8x96xf32> to vector<8x32xf32>
    %10 = arith.truncf %9 : vector<8x32xf32> to vector<8x32xbf16>
    %11 = vector.shape_cast %10 : vector<8x32xbf16> to vector<1x8x32xbf16>
    %12 = vector.extract_strided_slice %3 {offsets = [0, 64], sizes = [8, 32], strides = [1, 1]} : vector<8x96xf32> to vector<8x32xf32>
    %13 = arith.truncf %12 : vector<8x32xf32> to vector<8x32xbf16>
    %14 = vector.shape_cast %13 : vector<8x32xbf16> to vector<1x8x32xbf16>
    %15 = tpu.iota {dimensions = array<i32: 0>} : vector<8x8xi32>
    %16 = tpu.iota {dimensions = array<i32: 1>} : vector<8x8xi32>
    %17 = arith.cmpi sle, %16, %15 : vector<8x8xi32>
    %cst_5 = arith.constant 0.000000e+00 : f32
    %cst_6 = arith.constant -1.000000e+30 : f32
    %18 = vector.broadcast %cst_5 : f32 to vector<8x8xf32>
    %19 = vector.broadcast %cst_6 : f32 to vector<8x8xf32>
    %20 = arith.select %17, %18, %19 : vector<8x8xi1>, vector<8x8xf32>
    %21 = vector.shape_cast %20 : vector<8x8xf32> to vector<1x8x8xf32>
    %cst_7 = arith.constant 0.000000e+00 : f32
    %22 = vector.broadcast %cst_7 : f32 to vector<8x32xf32>
    %23 = vector.extract_strided_slice %8 {offsets = [0, 0, 0], sizes = [1, 8, 8], strides = [1, 1, 1]} : vector<1x8x32xbf16> to vector<1x8x8xbf16>
    %24 = vector.extract_strided_slice %11 {offsets = [0, 0, 0], sizes = [1, 8, 8], strides = [1, 1, 1]} : vector<1x8x32xbf16> to vector<1x8x8xbf16>
    %25 = vector.extract_strided_slice %14 {offsets = [0, 0, 0], sizes = [1, 8, 8], strides = [1, 1, 1]} : vector<1x8x32xbf16> to vector<1x8x8xbf16>
    "tpu.trace_start"() <{level = 10 : i32, message = "bqd,bkd->bqk"}> : () -> ()
    %cst_8 = arith.constant dense<0.000000e+00> : vector<1x8x8xf32>
    %26 = tpu.matmul %23, %24, %cst_8 {dimension_numbers = #tpu.dot_dimension_numbers<[2], [2], [1], [1], [0, 0, 0, 1, 1, 1], [0], [0]>} : vector<1x8x8xbf16>, vector<1x8x8xbf16>, vector<1x8x8xf32> -> vector<1x8x8xf32>
    "tpu.trace_stop"() : () -> ()
    %27 = arith.addf %26, %21 : vector<1x8x8xf32>
    %cst_9 = arith.constant dense<0xFF800000> : vector<1x8xf32>
    %28 = vector.multi_reduction <maximumf>, %27, %cst_9 [2] : vector<1x8x8xf32> to vector<1x8xf32>
    %29 = vector.shape_cast %28 : vector<1x8xf32> to vector<1x8x1xf32>
    %30 = vector.broadcast %29 : vector<1x8x1xf32> to vector<1x8x8xf32>
    %31 = arith.subf %27, %30 : vector<1x8x8xf32>
    %32 = math.exp %31 : vector<1x8x8xf32>
    %cst_10 = arith.constant dense<0.000000e+00> : vector<1x8xf32>
    %33 = vector.multi_reduction <add>, %32, %cst_10 [2] : vector<1x8x8xf32> to vector<1x8xf32>
    %34 = vector.shape_cast %33 : vector<1x8xf32> to vector<1x8x1xf32>
    %35 = tpu.reciprocal %34 {approx = true} : vector<1x8x1xf32> -> vector<1x8x1xf32>
    %36 = arith.truncf %32 : vector<1x8x8xf32> to vector<1x8x8xbf16>
    "tpu.trace_start"() <{level = 10 : i32, message = "bqk,bkd->bqd"}> : () -> ()
    %cst_11 = arith.constant dense<0.000000e+00> : vector<1x8x8xf32>
    %37 = tpu.matmul %36, %25, %cst_11 {dimension_numbers = #tpu.dot_dimension_numbers<[2], [1], [1], [2], [0, 0, 0, 1, 1, 2], [0], [0]>} : vector<1x8x8xbf16>, vector<1x8x8xbf16>, vector<1x8x8xf32> -> vector<1x8x8xf32>
    "tpu.trace_stop"() : () -> ()
    %38 = vector.broadcast %35 : vector<1x8x1xf32> to vector<1x8x8xf32>
    %39 = arith.mulf %37, %38 : vector<1x8x8xf32>
    %40 = vector.shape_cast %39 : vector<1x8x8xf32> to vector<8x8xf32>
    %41 = arith.truncf %40 : vector<8x8xf32> to vector<8x8xbf16>
    %c0_12 = arith.constant 0 : index
    %c0_13 = arith.constant 0 : index
    %42 = vector.load %arg3[%c0_12, %c0_13] : memref<32x32xbf16, #tpu.memory_space<vmem>>, vector<8x32xbf16>
    %cst_14 = arith.constant dense<0.000000e+00> : vector<8x32xf32>
    %43 = tpu.matmul %41, %42, %cst_14 {dimension_numbers = #tpu.dot_dimension_numbers<[1], [0], [0], [1], [0, 0, 1, 1], [], []>} : vector<8x8xbf16>, vector<8x32xbf16>, vector<8x32xf32> -> vector<8x32xf32>
    %44 = arith.addf %22, %43 : vector<8x32xf32>
    %45 = vector.extract_strided_slice %8 {offsets = [0, 0, 8], sizes = [1, 8, 8], strides = [1, 1, 1]} : vector<1x8x32xbf16> to vector<1x8x8xbf16>
    %46 = vector.extract_strided_slice %11 {offsets = [0, 0, 8], sizes = [1, 8, 8], strides = [1, 1, 1]} : vector<1x8x32xbf16> to vector<1x8x8xbf16>
    %47 = vector.extract_strided_slice %14 {offsets = [0, 0, 8], sizes = [1, 8, 8], strides = [1, 1, 1]} : vector<1x8x32xbf16> to vector<1x8x8xbf16>
    "tpu.trace_start"() <{level = 10 : i32, message = "bqd,bkd->bqk"}> : () -> ()
    %cst_15 = arith.constant dense<0.000000e+00> : vector<1x8x8xf32>
    %48 = tpu.matmul %45, %46, %cst_15 {dimension_numbers = #tpu.dot_dimension_numbers<[2], [2], [1], [1], [0, 0, 0, 1, 1, 1], [0], [0]>} : vector<1x8x8xbf16>, vector<1x8x8xbf16>, vector<1x8x8xf32> -> vector<1x8x8xf32>
    "tpu.trace_stop"() : () -> ()
    %49 = arith.addf %48, %21 : vector<1x8x8xf32>
    %cst_16 = arith.constant dense<0xFF800000> : vector<1x8xf32>
    %50 = vector.multi_reduction <maximumf>, %49, %cst_16 [2] : vector<1x8x8xf32> to vector<1x8xf32>
    %51 = vector.shape_cast %50 : vector<1x8xf32> to vector<1x8x1xf32>
    %52 = vector.broadcast %51 : vector<1x8x1xf32> to vector<1x8x8xf32>
    %53 = arith.subf %49, %52 : vector<1x8x8xf32>
    %54 = math.exp %53 : vector<1x8x8xf32>
    %cst_17 = arith.constant dense<0.000000e+00> : vector<1x8xf32>
    %55 = vector.multi_reduction <add>, %54, %cst_17 [2] : vector<1x8x8xf32> to vector<1x8xf32>
    %56 = vector.shape_cast %55 : vector<1x8xf32> to vector<1x8x1xf32>
    %57 = tpu.reciprocal %56 {approx = true} : vector<1x8x1xf32> -> vector<1x8x1xf32>
    %58 = arith.truncf %54 : vector<1x8x8xf32> to vector<1x8x8xbf16>
    "tpu.trace_start"() <{level = 10 : i32, message = "bqk,bkd->bqd"}> : () -> ()
    %cst_18 = arith.constant dense<0.000000e+00> : vector<1x8x8xf32>
    %59 = tpu.matmul %58, %47, %cst_18 {dimension_numbers = #tpu.dot_dimension_numbers<[2], [1], [1], [2], [0, 0, 0, 1, 1, 2], [0], [0]>} : vector<1x8x8xbf16>, vector<1x8x8xbf16>, vector<1x8x8xf32> -> vector<1x8x8xf32>
    "tpu.trace_stop"() : () -> ()
    %60 = vector.broadcast %57 : vector<1x8x1xf32> to vector<1x8x8xf32>
    %61 = arith.mulf %59, %60 : vector<1x8x8xf32>
    %62 = vector.shape_cast %61 : vector<1x8x8xf32> to vector<8x8xf32>
    %63 = arith.truncf %62 : vector<8x8xf32> to vector<8x8xbf16>
    %c8 = arith.constant 8 : index
    %c0_19 = arith.constant 0 : index
    %64 = vector.load %arg3[%c8, %c0_19] : memref<32x32xbf16, #tpu.memory_space<vmem>>, vector<8x32xbf16>
    %cst_20 = arith.constant dense<0.000000e+00> : vector<8x32xf32>
    %65 = tpu.matmul %63, %64, %cst_20 {dimension_numbers = #tpu.dot_dimension_numbers<[1], [0], [0], [1], [0, 0, 1, 1], [], []>} : vector<8x8xbf16>, vector<8x32xbf16>, vector<8x32xf32> -> vector<8x32xf32>
    %66 = arith.addf %44, %65 : vector<8x32xf32>
    %67 = vector.extract_strided_slice %8 {offsets = [0, 0, 16], sizes = [1, 8, 8], strides = [1, 1, 1]} : vector<1x8x32xbf16> to vector<1x8x8xbf16>
    %68 = vector.extract_strided_slice %11 {offsets = [0, 0, 16], sizes = [1, 8, 8], strides = [1, 1, 1]} : vector<1x8x32xbf16> to vector<1x8x8xbf16>
    %69 = vector.extract_strided_slice %14 {offsets = [0, 0, 16], sizes = [1, 8, 8], strides = [1, 1, 1]} : vector<1x8x32xbf16> to vector<1x8x8xbf16>
    "tpu.trace_start"() <{level = 10 : i32, message = "bqd,bkd->bqk"}> : () -> ()
    %cst_21 = arith.constant dense<0.000000e+00> : vector<1x8x8xf32>
    %70 = tpu.matmul %67, %68, %cst_21 {dimension_numbers = #tpu.dot_dimension_numbers<[2], [2], [1], [1], [0, 0, 0, 1, 1, 1], [0], [0]>} : vector<1x8x8xbf16>, vector<1x8x8xbf16>, vector<1x8x8xf32> -> vector<1x8x8xf32>
    "tpu.trace_stop"() : () -> ()
    %71 = arith.addf %70, %21 : vector<1x8x8xf32>
    %cst_22 = arith.constant dense<0xFF800000> : vector<1x8xf32>
    %72 = vector.multi_reduction <maximumf>, %71, %cst_22 [2] : vector<1x8x8xf32> to vector<1x8xf32>
    %73 = vector.shape_cast %72 : vector<1x8xf32> to vector<1x8x1xf32>
    %74 = vector.broadcast %73 : vector<1x8x1xf32> to vector<1x8x8xf32>
    %75 = arith.subf %71, %74 : vector<1x8x8xf32>
    %76 = math.exp %75 : vector<1x8x8xf32>
    %cst_23 = arith.constant dense<0.000000e+00> : vector<1x8xf32>
    %77 = vector.multi_reduction <add>, %76, %cst_23 [2] : vector<1x8x8xf32> to vector<1x8xf32>
    %78 = vector.shape_cast %77 : vector<1x8xf32> to vector<1x8x1xf32>
    %79 = tpu.reciprocal %78 {approx = true} : vector<1x8x1xf32> -> vector<1x8x1xf32>
    %80 = arith.truncf %76 : vector<1x8x8xf32> to vector<1x8x8xbf16>
    "tpu.trace_start"() <{level = 10 : i32, message = "bqk,bkd->bqd"}> : () -> ()
    %cst_24 = arith.constant dense<0.000000e+00> : vector<1x8x8xf32>
    %81 = tpu.matmul %80, %69, %cst_24 {dimension_numbers = #tpu.dot_dimension_numbers<[2], [1], [1], [2], [0, 0, 0, 1, 1, 2], [0], [0]>} : vector<1x8x8xbf16>, vector<1x8x8xbf16>, vector<1x8x8xf32> -> vector<1x8x8xf32>
    "tpu.trace_stop"() : () -> ()
    %82 = vector.broadcast %79 : vector<1x8x1xf32> to vector<1x8x8xf32>
    %83 = arith.mulf %81, %82 : vector<1x8x8xf32>
    %84 = vector.shape_cast %83 : vector<1x8x8xf32> to vector<8x8xf32>
    %85 = arith.truncf %84 : vector<8x8xf32> to vector<8x8xbf16>
    %c16 = arith.constant 16 : index
    %c0_25 = arith.constant 0 : index
    %86 = vector.load %arg3[%c16, %c0_25] : memref<32x32xbf16, #tpu.memory_space<vmem>>, vector<8x32xbf16>
    %cst_26 = arith.constant dense<0.000000e+00> : vector<8x32xf32>
    %87 = tpu.matmul %85, %86, %cst_26 {dimension_numbers = #tpu.dot_dimension_numbers<[1], [0], [0], [1], [0, 0, 1, 1], [], []>} : vector<8x8xbf16>, vector<8x32xbf16>, vector<8x32xf32> -> vector<8x32xf32>
    %88 = arith.addf %66, %87 : vector<8x32xf32>
    %89 = vector.extract_strided_slice %8 {offsets = [0, 0, 24], sizes = [1, 8, 8], strides = [1, 1, 1]} : vector<1x8x32xbf16> to vector<1x8x8xbf16>
    %90 = vector.extract_strided_slice %11 {offsets = [0, 0, 24], sizes = [1, 8, 8], strides = [1, 1, 1]} : vector<1x8x32xbf16> to vector<1x8x8xbf16>
    %91 = vector.extract_strided_slice %14 {offsets = [0, 0, 24], sizes = [1, 8, 8], strides = [1, 1, 1]} : vector<1x8x32xbf16> to vector<1x8x8xbf16>
    "tpu.trace_start"() <{level = 10 : i32, message = "bqd,bkd->bqk"}> : () -> ()
    %cst_27 = arith.constant dense<0.000000e+00> : vector<1x8x8xf32>
    %92 = tpu.matmul %89, %90, %cst_27 {dimension_numbers = #tpu.dot_dimension_numbers<[2], [2], [1], [1], [0, 0, 0, 1, 1, 1], [0], [0]>} : vector<1x8x8xbf16>, vector<1x8x8xbf16>, vector<1x8x8xf32> -> vector<1x8x8xf32>
    "tpu.trace_stop"() : () -> ()
    %93 = arith.addf %92, %21 : vector<1x8x8xf32>
    %cst_28 = arith.constant dense<0xFF800000> : vector<1x8xf32>
    %94 = vector.multi_reduction <maximumf>, %93, %cst_28 [2] : vector<1x8x8xf32> to vector<1x8xf32>
    %95 = vector.shape_cast %94 : vector<1x8xf32> to vector<1x8x1xf32>
    %96 = vector.broadcast %95 : vector<1x8x1xf32> to vector<1x8x8xf32>
    %97 = arith.subf %93, %96 : vector<1x8x8xf32>
    %98 = math.exp %97 : vector<1x8x8xf32>
    %cst_29 = arith.constant dense<0.000000e+00> : vector<1x8xf32>
    %99 = vector.multi_reduction <add>, %98, %cst_29 [2] : vector<1x8x8xf32> to vector<1x8xf32>
    %100 = vector.shape_cast %99 : vector<1x8xf32> to vector<1x8x1xf32>
    %101 = tpu.reciprocal %100 {approx = true} : vector<1x8x1xf32> -> vector<1x8x1xf32>
    %102 = arith.truncf %98 : vector<1x8x8xf32> to vector<1x8x8xbf16>
    "tpu.trace_start"() <{level = 10 : i32, message = "bqk,bkd->bqd"}> : () -> ()
    %cst_30 = arith.constant dense<0.000000e+00> : vector<1x8x8xf32>
    %103 = tpu.matmul %102, %91, %cst_30 {dimension_numbers = #tpu.dot_dimension_numbers<[2], [1], [1], [2], [0, 0, 0, 1, 1, 2], [0], [0]>} : vector<1x8x8xbf16>, vector<1x8x8xbf16>, vector<1x8x8xf32> -> vector<1x8x8xf32>
    "tpu.trace_stop"() : () -> ()
    %104 = vector.broadcast %101 : vector<1x8x1xf32> to vector<1x8x8xf32>
    %105 = arith.mulf %103, %104 : vector<1x8x8xf32>
    %106 = vector.shape_cast %105 : vector<1x8x8xf32> to vector<8x8xf32>
    %107 = arith.truncf %106 : vector<8x8xf32> to vector<8x8xbf16>
    %c24 = arith.constant 24 : index
    %c0_31 = arith.constant 0 : index
    %108 = vector.load %arg3[%c24, %c0_31] : memref<32x32xbf16, #tpu.memory_space<vmem>>, vector<8x32xbf16>
    %cst_32 = arith.constant dense<0.000000e+00> : vector<8x32xf32>
    %109 = tpu.matmul %107, %108, %cst_32 {dimension_numbers = #tpu.dot_dimension_numbers<[1], [0], [0], [1], [0, 0, 1, 1], [], []>} : vector<8x8xbf16>, vector<8x32xbf16>, vector<8x32xf32> -> vector<8x32xf32>
    %110 = arith.addf %88, %109 : vector<8x32xf32>
    %111 = vector.shape_cast %110 : vector<8x32xf32> to vector<1x8x32xf32>
    %c0_33 = arith.constant 0 : index
    %c0_34 = arith.constant 0 : index
    %c0_35 = arith.constant 0 : index
    %112 = vector.load %arg4[%c0_33, %c0_34, %c0_35] : memref<1x8x32xf32, #tpu.memory_space<vmem>>, vector<1x8x32xf32>
    tpu.vector_store %arg4[%c0_33, %c0_34, %c0_35], %111 {strides = array<i32>} : memref<1x8x32xf32, #tpu.memory_space<vmem>>, vector<1x8x32xf32>,
    return
  }
  func.func @transform_0(%arg0: i32) -> (i32, i32, i32) {
    %c0_i32 = arith.constant 0 : i32
    %c0_i32_0 = arith.constant 0 : i32
    %c0_i32_1 = arith.constant 0 : i32
    return %arg0, %c0_i32, %c0_i32_0 : i32, i32, i32
  }
  func.func @transform_1(%arg0: i32) -> (i32, i32) {
    %c0_i32 = arith.constant 0 : i32
    %c0_i32_0 = arith.constant 0 : i32
    %c0_i32_1 = arith.constant 0 : i32
    return %c0_i32, %c0_i32_0 : i32, i32
  }
  func.func @transform_2(%arg0: i32) -> (i32, i32) {
    %c0_i32 = arith.constant 0 : i32
    %c0_i32_0 = arith.constant 0 : i32
    %c0_i32_1 = arith.constant 0 : i32
    return %c0_i32, %c0_i32_0 : i32, i32
  }
  func.func @transform_3(%arg0: i32) -> (i32, i32, i32) {
    %c0_i32 = arith.constant 0 : i32
    %c0_i32_0 = arith.constant 0 : i32
    %c0_i32_1 = arith.constant 0 : i32
    return %arg0, %c0_i32, %c0_i32_0 : i32, i32, i32
  }
}

</mosaic_0001>

<bundles_post_ra>
// kernel: tpu_custom_call.1
= control target key start
LH: loop header
LB: loop body
LE: loop exit
PB: predicated region body
PF: predicated region fallthrough
CT: control target
= control target key end

     0   :  { %8 = vsyncpa [#allocation3], 0  ;;  %s1217_s0 = inlined_call_operand.hbm [shape: bf16[2,8,32], index: 0, kind: input, shape index: {}]   ;;  %s1218_s1 = inlined_call_operand.hbm [shape: bf16[32,96], index: 1, kind: input, shape index: {}]   ;;  %s1219_s2 = inlined_call_operand.hbm [shape: bf16[32,32], index: 2, kind: input, shape index: {}]   ;;  %s1220_s3 = inlined_call_operand.hbm [shape: f32[2,8,32], index: 3, kind: output, shape index: {}]  }
   0x1   :  { %10 = vsyncpa [#allocation3 + $0x1], 0 }
   0x2   :  { %11 = vsyncpa [#allocation6], 0 }
   0x3   :  { %12 = vsyncpa [#allocation4], 0 }
   0x4   :  { %14 = vsyncpa [#allocation4 + $0x1], 0  ;;  %s1021_s12 = smov 0   ;;  %s1023_s13 = smov 0  }
   0x5   :  { %s1025_s14 = smov 0   ;;  %s1027_s15 = smov 0  }
   0x6 LB: > { %s130_s18 = sshll.u32 %s1218_s1, 4  ;;  %s1045_s19 = sadd.s32 4294967295, %s983_s15   ;;  %s983_s15 = sphi %s1027_s15, %s1231_s15   ;;  %s979_s14 = sphi %s1025_s14, %s1230_s14   ;;  %s975_s13 = sphi %s1023_s13, %s1229_s13   ;;  %s971_s12 = sphi %s1021_s12, %s1228_s12   ;;  %s131_s18 = int_to_ptr.hbm [resolvable:$true] %s130_s18 }
   0x7   : > { %p688_p0 = scmp.ge.s32.totalorder %s983_s15, 1  ;;  %p41_p1 = scmp.eq.s32.totalorder %s1045_s19, 0 }
   0x8   : > { %p119_p2 = scmp.lt.s32.totalorder %s983_s15, 3  ;;  %s985_s21 = smov [#allocation5]  }
   0x9   : > { %s132_s22 = sshll.u32 %s985_s21, 4  ;;  %s144_s25 = sshll.u32 %s1219_s2, 4  ;;  %s133_s22 = int_to_ptr.vmem [resolvable:$true] %s132_s22  ;;  %s145_s25 = int_to_ptr.hbm [resolvable:$true] %s144_s25 }
   0xa   : > { %p1050_p3 = pnand %p688_p0, %p119_p2  ;;  %s986_s26 = smov [#allocation7]  }
   0xb   : > { %s146_s27 = sshll.u32 %s986_s26, 4  ;;  %s987_s28 = smov 64   ;;  %s147_s27 = int_to_ptr.vmem [resolvable:$true] %s146_s27 }
   0xc   : > { %p738_p4 = pneg %p1050_p3  ;;  %s988_s29 = smov 4  }
   0xd   : > { %s687_s30 = sadd.s32 4294967294, %s983_s15   ;;  %s1064_s4 = sadd.s32 1, %s983_s15  }
   0xe   : > { %p739_p6 = pnand %p738_p4, %p41_p1  ;;  %s24_s5 = ssub.s32 %s983_s15, %s1064_s4 }
   0xf   : > { %s27_s6 = sadd.s32 1, %s979_s14  ;;  %p25_p7 = scmp.eq.s32.totalorder %s24_s5, 0 }
  0x10   : > { %741 = dma.hbm_to_vmem [thread:$0]  (!%p739_p6), %s131_s18, 256, %s133_s22, [#allocation6], %s987_s28, %s987_s28, %s988_s29  }
  0x11   : > { %744 = dma.hbm_to_vmem [thread:$0]  (!%p739_p6), %s145_s25, 256, %s147_s27, [#allocation6], %s987_s28, %s987_s28, %s988_s29  }
  0x12   : > { %p34_p8 = scmp.ne.s32.totalorder %s979_s14, %s975_s13  ;;  %p35_p9 = scmp.eq.s32.totalorder %s983_s15, 0 }
  0x13   : > { %p40_p10 = scmp.ne.s32.totalorder %s975_s13, %s971_s12  ;;  %p106_p13 = scmp.eq.s32.totalorder %s1045_s19, 1 }
  0x14   : > { %s1075_s7 = scalar_select %p25_p7, %s979_s14, %s27_s6  }
  0x15   : > { %p1077_p11 = por %p35_p9, %p34_p8  ;;  %p1083_p12 = por %p41_p1, %p40_p10 }
  0x16   : > { %p112_p0 = scmp.eq.s32.totalorder %s687_s30, 1  ;;  %p755_p2 = scmp.lt.s32.totalorder %s983_s15, 2 }
  0x17   : > { %s160_s10 = sand.u32 1, %s979_s14   ;;  %p1090_p4 = por %p106_p13, %p34_p8 }
  0x18   : > { %p1094_p6 = por %p112_p0, %p40_p10  ;;  %s692_s17 = sshll.u32 %s160_s10, 2 }
  0x19   : > { %s693_s18 = sshll.u32 %s983_s15, 2  ;;  %s164_s24 = scalar_lea.vmem [#allocation2], %s692_s17 }
  0x1a   : > { %s168_s23 = scalar_lea.hbm %s1217_s0, %s693_s18  ;;  %s172_s25 = sshll.u32 %s164_s24, 4  ;;  %s173_s25 = int_to_ptr.vmem [resolvable:$true] %s172_s25 }
  0x1b   : > { %s170_s26 = sshll.u32 %s168_s23, 4  ;;  %p1104_p7 = pnand %p755_p2, %p1077_p11  ;;  %s171_s26 = int_to_ptr.hbm [resolvable:$true] %s170_s26 }
  0x1c   : > { %s161_s28 = scalar_lea.sflag [#allocation3], %s160_s10  ;;  %s883_s29 = sshra.s32 %s171_s26, 4  ;;  %s884_s29 = int_to_ptr.hbm [resolvable:$true] %s883_s29 }
  0x1d   : > { %s885_s30 = scalar_lea.hbm %s884_s29, 4  ;;  %p887_p9 = pneg %p1104_p7 }
  0x1e   : > { %p886_p8 = scmp.ne.s32.totalorder %s884_s29, %s885_s30  ;;  %s890_s17 = scalar_lea.hbm %s1217_s0, 8 }
  0x1f   : > { %p891_p11 = scmp.lt.s32.totalorder %s884_s29, %s1217_s0  ;;  %p892_p0 = scmp.lt.s32.totalorder %s890_s17, %s885_s30 }
  0x20   : > { %p888_p10 = pnand %p887_p9, %p886_p8 }
  0x21   : > { %p893_p2 = por %p892_p0, %p891_p11 }
  0x22   : > { %p889_p13 = pneg %p888_p10 }
  0x24   : > { %p894_p5 = pnand %p893_p2, %p889_p13 }
  0x26   : > { %897 = shalt.err (!%p894_p5)
}
  0x27   : > { %748 = dma.hbm_to_vmem [thread:$0]  (!%p1104_p7), %s171_s26, 64, %s173_s25, %s161_s28  }
  0x28   : > { %181 = sbr.rel (%p1050_p3) target bundleno = 1271 (0x4f7), region = 32  ;;  %s1121_s10 = sand.u32 (!%p1050_p3), 1, %s975_s13  }
  0x29   : > { %s695_s21 = sshll.u32 (!%p1050_p3), %s1121_s10, 2  ;;  %s184_s22 = scalar_lea.sflag (!%p1050_p3), [#allocation3], %s1121_s10 }
  0x2a   : > { %s187_s23 = scalar_lea.vmem (!%p1050_p3), [#allocation2], %s695_s21 }
  0x2d   : > { %958 = dma.done.wait (%p1083_p12), %s184_s22, 64  }
  0x2e   : > { %960 = vsyncadd (%p1083_p12), %s184_s22, 4294967232 }
  0x2f   : > { %962 = dma.done.wait (%p41_p1), [#allocation6], 512  }
  0x30   : > { %964 = vsyncadd (%p41_p1), [#allocation6], 4294966784  ;;  %v725_v0 = vld [vmem:[#allocation5 + $0x8] sm:$0xff]  ;;  %v724_v1 = vld [vmem:[#allocation5] sm:$0xff]  ;;  %vm239_vm0 = vcmask 261120   ;;  %s989_s20 = smov 88   ;;  %v259_v26 = vlaneseq }
  0x31   : > { %249 = vmatpush.bf16.msra.mxu0 %v725_v0  ;;  %v222_v2 = vld [vmem:[%s187_s23] sm:$0xf]  ;;  %s990_s9 = smov 64   ;;  %s991_s24 = smov 96   ;;  %vm270_vm1 = vcmask 64512   ;;  %vm306_vm2 = vcmask 1043456  }
  0x32   : > { %s992_s25 = smov 120   ;;  %s993_s26 = smov 80   ;;  %v325_v17 = vld [vmem:[#allocation7] sm:$0xf]  ;;  %v260_v27 = vshrl.u32 %v259_v26, 7  ;;  %v262_v28 = vand.u32 127, %v259_v26 }
  0x33   : > { %s994_s27 = smov 72   ;;  %s995_s28 = smov 112   ;;  %v410_v22 = vsel %vm306_vm2, %v325_v17, 0  ;;  %v997_v29 = vmov -1e+30  }
  0x34   : > { %s996_s29 = smov 104   ;;  %vm263_vm3 = vcmp.le.s32.totalorder %v262_v28, %v260_v27  ;;  %s998_s30 = smov 56   ;;  %v386_v61 = vld [vmem:[#allocation7 + $0x4] sm:$0xf] }
  0x35   : > { %250 = vmatpush.bf16.msra.mxu0 %v724_v1  ;;  %v1150_v30 = vsel %vm263_vm3, 0.0, %v997_v29  ;;  %s999_s5 = smov 48   ;;  %v391_v62 = vsel %vm306_vm2, %v386_v61, 0  ;;  %s1000_s6 = smov 40  }
  0x36   : > { %s721_s17 = sshll.u32 %s1045_s19, 3  ;;  %s698_s18 = sshll.u32 %s1121_s10, 3 }
  0x37   : > { %s593_s22 = scalar_lea.hbm %s1220_s3, %s721_s17  ;;  %s220_s23 = scalar_lea.vmem [#allocation8], %s698_s18 }
  0x38   : > { %707 = vmatmul.msk.bf16.vlgmr.msra.gmra.mxu0 %vm239_vm0, %v222_v2 }
  0x39   : > { %400 = vmatpush.bf16.msrb.mxu0 %v391_v62 }
  0xb5   : > { %v252_v3 = vpop.f32.mrf.mxu0 }
  0xb6   : > { %v256_v4 = vmul.f32 0.35355338, %v252_v3  ;;  %v258_v5 = vpack.c.bf16 %v252_v3, %v252_v3 }
  0xb8   : > { %v266_v6 = vunpack.c.l.b16 %v258_v5  ;;  %v257_v7 = vpack.c.bf16 %v256_v4, %v256_v4 }
  0xba   : > { %v1134_v8 = vpack.c.b16 %v266_v6, %v266_v6  ;;  %v327_v10 = vunpack.c.l.b16 %v257_v7 }
  0xbc   : > { %331 = vrot.lane.b32.xlu2 %v1134_v8, %s989_s20  ;;  %301 = vrot.lane.b32.xlu1 %v1134_v8, %s990_s9  ;;  %v328_v11 = vpack.c.b16 %v327_v10, %v327_v10  ;;  %s595_s20 = sshll.u32 %s220_s23, 4  ;;  %s597_s9 = sshll.u32 %s593_s22, 4  ;;  %s596_s20 = int_to_ptr.vmem [resolvable:$true] %s595_s20  ;;  %s598_s9 = int_to_ptr.hbm [resolvable:$true] %s597_s9 }
  0xbd   : > { %268 = vrot.lane.b32.xlu0 %v1134_v8, %s991_s24  ;;  %v254_v9 = vpop.f32.mrf.mxu0  ;;  %s583_s24 = scalar_lea.sflag [#allocation4], %s1121_s10 }
  0xc4   : > { %329 = vrot.lane.b32.xlu2 %v328_v11, %s992_s25  ;;  %s927_s25 = sshra.s32 %s598_s9, 4  ;;  %s928_s25 = int_to_ptr.hbm [resolvable:$true] %s927_s25 }
  0xc5   : > { %p934_p12 = scmp.lt.s32.totalorder %s928_s25, %s1220_s3 }
  0xcc   : > { %427 = vrot.lane.b32.xlu2 %v1134_v8, %s993_s26  ;;  %s929_s26 = scalar_lea.hbm %s928_s25, 8 }
  0xcd   : > { %p930_p1 = scmp.ne.s32.totalorder %s928_s25, %s929_s26 }
  0xcf   : > { %p931_p3 = pnand %p930_p1, %p1090_p4 }
  0xd1   : > { %p932_p5 = pneg %p931_p3 }
  0xd4   : > { %505 = vrot.lane.b32.xlu2 %v1134_v8, %s994_s27 }
  0xdc   : > { %425 = vrot.lane.b32.xlu2 %v328_v11, %s995_s28  ;;  %s933_s28 = scalar_lea.hbm %s1220_s3, 16 }
  0xdd   : > { %p935_p7 = scmp.lt.s32.totalorder %s933_s28, %s929_s26 }
  0xdf   : > { %p936_p8 = por %p935_p7, %p934_p12 }
  0xe1   : > { %p937_p9 = pnand %p936_p8, %p932_p5 }
  0xe4   : > { %503 = vrot.lane.b32.xlu2 %v328_v11, %s996_s29 }
 0x116   : > { %v332_v12 = vpop.permute.xlu2 %331 }
 0x117   : > { %v337_v13 = vsel %vm270_vm1, %v332_v12, 0 }
 0x118   : > { %346 = vmatpush.bf16.xpose.msra.mxu3 %v337_v13 }
 0x11e   : > { %v330_v14 = vpop.permute.xlu2 %329 }
 0x11f   : > { %710 = vmatmul.msk.bf16.vlgmr.msra.gmra.mxu3 %vm270_vm1, %v330_v14 }
 0x126   : > { %v428_v15 = vpop.permute.xlu2 %427 }
 0x127   : > { %v433_v16 = vsel %vm270_vm1, %v428_v15, 0 }
 0x128   : > { %442 = vmatpush.bf16.xpose.msrb.mxu3 %v433_v16 }
 0x12e   : > { %v302_v18 = vpop.permute.xlu1 %301  ;;  %v506_v19 = vpop.permute.xlu2 %505 }
 0x12f   : > { %v269_v20 = vpop.permute.xlu0 %268  ;;  %v308_v21 = vsel %vm306_vm2, %v302_v18, 0  ;;  %v511_v25 = vsel %vm270_vm1, %v506_v19, 0 }
 0x130   : > { %v275_v23 = vsel %vm270_vm1, %v269_v20, 0  ;;  %317 = vmatpush.bf16.msra.mxu2 %v308_v21 }
 0x131   : > { %284 = vmatpush.bf16.xpose.msra.mxu1 %v275_v23 }
 0x136   : > { %v426_v24 = vpop.permute.xlu2 %425 }
 0x137   : > { %714 = vmatmul.msk.bf16.vlgmr.msrb.gmra.mxu3 %vm270_vm1, %v426_v24 }
 0x138   : > { %708 = vmatmul.msk.bf16.vlgmr.msra.gmra.mxu1 %vm270_vm1, %v257_v7 }
 0x139   : > { %419 = vmatpush.bf16.msrb.mxu1 %v410_v22 }
 0x13d   : > { %520 = vmatpush.bf16.xpose.msra.mxu1 %v511_v25 }
 0x13e   : > { %v504_v41 = vpop.permute.xlu2 %503 }
 0x1a2   : > { %v348_v31 = vpop.f32.mrf.mxu3 }
 0x1a3   : > { %v349_v32 = vadd.f32 %v348_v31, %v1150_v30 }
 0x1a5   : > { %v352_v33 = vsel %vm270_vm1, %v349_v32, -inf }
 0x1a6   : > { %353 = vmax.xlane.f32.xlu2 %v352_v33 }
 0x1aa   : > { %v350_v34 = vpop.f32.mrf.mxu3 }
 0x1b5   : > { %v286_v35 = vpop.f32.mrf.mxu1 }
 0x1b6   : > { %v287_v36 = vadd.f32 %v286_v35, %v1150_v30 }
 0x1b8   : > { %v290_v37 = vsel %vm270_vm1, %v287_v36, -inf }
 0x1b9   : > { %291 = vmax.xlane.f32.xlu0 %v290_v37 }
 0x1ba   : > { %v444_v38 = vpop.f32.mrf.mxu3 }
 0x1bb   : > { %v445_v53 = vadd.f32 %v444_v38, %v1150_v30 }
 0x1bd   : > { %v288_v39 = vpop.f32.mrf.mxu1  ;;  %v448_v55 = vsel %vm270_vm1, %v445_v53, -inf }
 0x1c2   : > { %v446_v40 = vpop.f32.mrf.mxu3 }
 0x1cd   : > { %363 = vrot.lane.b32.xlu0 %v1134_v8, %s998_s30 }
 0x1d5   : > { %459 = vrot.lane.b32.xlu0 %v1134_v8, %s999_s5 }
 0x219   : > { %v354_v42 = vpop.xlane.xlu2 %353 }
 0x21a   : > { %v355_v43 = vsub.f32 %v349_v32, %v354_v42 }
 0x21c   : > { %v356_v44 = vmul.f32 1.442695, %v355_v43 }
 0x21e   : > { %807 = vpow2.f32 %v356_v44 }
 0x224   : > { %v808_v45 = vpop.eup %807 }
 0x225   : > { %v358_v46 = vsel %vm270_vm1, %v808_v45, 0.0  ;;  %v362_v59 = vpack.c.bf16 %v808_v45, %v808_v45 }
 0x226   : > { %359 = vadd.xlane.f32.xlu0 %v358_v46 }
 0x22c   : > { %v292_v47 = vpop.xlane.xlu0 %291 }
 0x22d   : > { %v293_v48 = vsub.f32 %v287_v36, %v292_v47  ;;  %v482_v36 = vld [vmem:[#allocation7 + $0x8] sm:$0xf] }
 0x22f   : > { %v294_v49 = vmul.f32 1.442695, %v293_v48 }
 0x231   : > { %809 = vpow2.f32 %v294_v49 }
 0x237   : > { %v810_v50 = vpop.eup %809 }
 0x238   : > { %v296_v51 = vsel %vm270_vm1, %v810_v50, 0.0  ;;  %v300_v52 = vpack.c.bf16 %v810_v50, %v810_v50 }
 0x239   : > { %297 = vadd.xlane.f32.xlu1 %v296_v51 }
 0x23a   : > { %709 = vmatmul.msk.bf16.vlgmr.msra.gmra.mxu2 %vm270_vm1, %v300_v52 }
 0x23f   : > { %v364_v54 = vpop.permute.xlu0 %363 }
 0x240   : > { %v369_v56 = vsel %vm306_vm2, %v364_v54, 0 }
 0x241   : > { %449 = vmax.xlane.f32.xlu1 %v448_v55  ;;  %378 = vmatpush.bf16.msrb.mxu2 %v369_v56 }
 0x247   : > { %v460_v57 = vpop.permute.xlu0 %459 }
 0x248   : > { %v465_v58 = vsel %vm306_vm2, %v460_v57, 0 }
 0x249   : > { %474 = vmatpush.bf16.msra.mxu2 %v465_v58 }
 0x24a   : > { %711 = vmatmul.msk.bf16.vlgmr.msrb.gmra.mxu2 %vm270_vm1, %v362_v59 }
 0x299   : > { %v360_v9 = vpop.xlane.xlu0 %359 }
 0x2ac   : > { %v298_v60 = vpop.xlane.xlu1 %297 }
 0x2ad   : > { %811 = vrcp.f32 %v298_v60 }
 0x2b3   : > { %v812_v2 = vpop.eup %811 }
 0x2b4   : > { %v450_v63 = vpop.xlane.xlu1 %449 }
 0x2b5   : > { %v451_v0 = vsub.f32 %v445_v53, %v450_v63 }
 0x2b7   : > { %v452_v1 = vmul.f32 1.442695, %v451_v0 }
 0x2b9   : > { %813 = vpow2.f32 %v452_v1 }
 0x2ba   : > { %815 = vrcp.f32 %v360_v9 }
 0x2bd   : > { %v319_v3 = vpop.f32.mrf.mxu2 }
 0x2be   : > { %v323_v4 = vmul.f32 %v812_v2, %v319_v3 }
 0x2bf   : > { %v814_v5 = vpop.eup %813 }
 0x2c0   : > { %v458_v6 = vpack.c.bf16 %v814_v5, %v814_v5  ;;  %v324_v7 = vpack.c.bf16 %v323_v4, %v323_v4  ;;  %v816_v11 = vpop.eup %815  ;;  %v454_v27 = vsel %vm270_vm1, %v814_v5, 0.0 }
 0x2c2   : > { %713 = vmatmul.msk.bf16.vlgmr.msrb.gmra.mxu1 %vm270_vm1, %v324_v7  ;;  %715 = vmatmul.msk.bf16.vlgmr.msra.gmra.mxu2 %vm270_vm1, %v458_v6 }
 0x2c5   : > { %v321_v10 = vpop.f32.mrf.mxu2 }
 0x2cd   : > { %v380_v12 = vpop.f32.mrf.mxu2 }
 0x2ce   : > { %v384_v13 = vmul.f32 %v816_v11, %v380_v12 }
 0x2d0   : > { %v385_v14 = vpack.c.bf16 %v384_v13, %v384_v13 }
 0x2d2   : > { %712 = vmatmul.msk.bf16.vlgmr.msrb.gmra.mxu0 %vm270_vm1, %v385_v14  ;;  %717 = vmatmul.msk.bf16.vlgmr.msra.gmra.mxu1 %vm270_vm1, %v504_v41  ;;  %v560_v41 = vld [vmem:[#allocation7 + $0xc] sm:$0xf] }
 0x2d3   : > { %v565_v42 = vsel %vm306_vm2, %v560_v41, 0 }
 0x2d4   : > { %574 = vmatpush.bf16.msrb.mxu2 %v565_v42 }
 0x2d5   : > { %v382_v15 = vpop.f32.mrf.mxu2 }
 0x33f   : > { %v421_v16 = vpop.f32.mrf.mxu1 }
 0x345   : > { %v476_v17 = vpop.f32.mrf.mxu2 }
 0x347   : > { %v423_v18 = vpop.f32.mrf.mxu1 }
 0x34d   : > { %v478_v19 = vpop.f32.mrf.mxu2 }
 0x34f   : > { %v402_v20 = vpop.f32.mrf.mxu0  ;;  %v522_v21 = vpop.f32.mrf.mxu1 }
 0x350   : > { %v422_v22 = vadd.f32 %v421_v16, %v402_v20  ;;  %v523_v23 = vadd.f32 %v522_v21, %v1150_v30 }
 0x352   : > { %v526_v24 = vsel %vm270_vm1, %v523_v23, -inf }
 0x353   : > { %527 = vmax.xlane.f32.xlu1 %v526_v24 }
 0x357   : > { %v404_v25 = vpop.f32.mrf.mxu0  ;;  %v524_v26 = vpop.f32.mrf.mxu1 }
 0x36c   : > { %537 = vrot.lane.b32.xlu1 %v1134_v8, %s1000_s6  ;;  %v487_v8 = vsel %vm306_vm2, %v482_v36, 0 }
 0x36d   : > { %496 = vmatpush.bf16.msra.mxu0 %v487_v8 }
 0x396   : > { %455 = vadd.xlane.f32.xlu1 %v454_v27 }
 0x3c6   : > { %v528_v28 = vpop.xlane.xlu1 %527 }
 0x3c7   : > { %v529_v29 = vsub.f32 %v523_v23, %v528_v28 }
 0x3c9   : > { %v530_v31 = vmul.f32 1.442695, %v529_v29 }
 0x3cb   : > { %817 = vpow2.f32 %v530_v31 }
 0x3d1   : > { %v818_v32 = vpop.eup %817 }
 0x3d2   : > { %v532_v33 = vsel %vm270_vm1, %v818_v32, 0.0  ;;  %v536_v35 = vpack.c.bf16 %v818_v32, %v818_v32 }
 0x3d3   : > { %533 = vadd.xlane.f32.xlu2 %v532_v33 }
 0x3de   : > { %v538_v30 = vpop.permute.xlu1 %537 }
 0x3df   : > { %v543_v34 = vsel %vm306_vm2, %v538_v30, 0 }
 0x3e0   : > { %552 = vmatpush.bf16.msra.mxu3 %v543_v34 }
 0x3e3   : > { %718 = vmatmul.msk.bf16.vlgmr.msra.gmra.mxu3 %vm270_vm1, %v536_v35 }
 0x409   : > { %v456_v37 = vpop.xlane.xlu1 %455 }
 0x40a   : > { %819 = vrcp.f32 %v456_v37 }
 0x410   : > { %v820_v38 = vpop.eup %819 }
 0x411   : > { %v480_v39 = vmul.f32 %v820_v38, %v476_v17 }
 0x413   : > { %v481_v40 = vpack.c.bf16 %v480_v39, %v480_v39 }
 0x415   : > { %716 = vmatmul.msk.bf16.vlgmr.msra.gmra.mxu0 %vm270_vm1, %v481_v40 }
 0x446   : > { %v534_v43 = vpop.xlane.xlu2 %533 }
 0x447   : > { %821 = vrcp.f32 %v534_v43 }
 0x44d   : > { %v822_v44 = vpop.eup %821 }
 0x466   : > { %v554_v45 = vpop.f32.mrf.mxu3 }
 0x467   : > { %v558_v46 = vmul.f32 %v822_v44, %v554_v45 }
 0x469   : > { %v559_v47 = vpack.c.bf16 %v558_v46, %v558_v46 }
 0x46b   : > { %719 = vmatmul.msk.bf16.vlgmr.msrb.gmra.mxu2 %vm270_vm1, %v559_v47 }
 0x46e   : > { %v556_v48 = vpop.f32.mrf.mxu3 }
 0x492   : > { %v498_v49 = vpop.f32.mrf.mxu0 }
 0x493   : > { %v502_v50 = vadd.f32 %v498_v49, %v422_v22 }
 0x49a   : > { %v500_v51 = vpop.f32.mrf.mxu0 }
 0x4ee   : > { %v576_v52 = vpop.f32.mrf.mxu2 }
 0x4ef   : > { %v580_v53 = vadd.f32 %v576_v52, %v502_v50 }
 0x4f1   : > { %581 = vst.msk [vmem:[%s220_s23] sm:$0xff] %vm239_vm0, %v580_v53 }
 0x4f2   : > { %940 = shalt.err (!%p937_p9)
}
 0x4f3   : > { %736 = dma.vmem_to_hbm [thread:$0]  (%p1090_p4), %s596_s20, 128, %s598_s9, %s583_s24  }
 0x4f6   : > { %v578_v54 = vpop.f32.mrf.mxu2 }
 0x4f7 PF: > { %s609_s10 = sand.u32 1, %s971_s12   ;;  %p1227_p10 = scmp.ge.s32.totalorder %s983_s15, 2 }
 0x4f8   : > { %s610_s5 = scalar_lea.sflag [#allocation4], %s609_s10 }
 0x4f9   : > { %p750_p13 = pnand %p1227_p10, %p1094_p6 }
 0x4fb   : > { %p751_p11 = pneg %p750_p13 }
 0x4fd   : > { %966 = dma.done.wait (%p751_p11), %s610_s5, 128  }
 0x4fe   : > { %968 = vsyncadd (%p751_p11), %s610_s5, 4294967168  ;;  %p17_p0 = scmp.ge.s32.totalorder %s1064_s4, 4   ;;  %s1228_s12 = smov %s975_s13 }
 0x4ff   : > { %s1229_s13 = smov %s979_s14  ;;  %s1230_s14 = smov %s1075_s7 }
 0x500   : > { %s1231_s15 = smov %s1064_s4  ;;  %19 = sbr.rel (!%p17_p0) target bundleno = 6 (0x6), region = 85 }
 0x505   :  { %616 = vsyncpa [#allocation3], 1 }
 0x506   :  { %618 = vsyncpa [#allocation3 + $0x1], 1 }
 0x507   :  { %619 = vsyncpa [#allocation6], 1 }
 0x508   :  { %620 = vsyncpa [#allocation4], 1 }
 0x509   :  { %622 = vsyncpa [#allocation4 + $0x1], 1 }

</bundles_post_ra>
